<compile_context>
chip_gen: v6e
topology: v6e:2x2x1
jax: 0.10.0
libtpu: 0.0.40
codegen_flags: <defaults>
</compile_context>

<pallas_src>
import math

import jax
import jax.numpy as jnp
from jax.experimental import pallas as pl
from jax.experimental.pallas import tpu as pltpu

NPAD = 128   # lane-dense packed output width (one full vreg lane span)
HALF = 64    # lane offset of the intent block inside the packed output


def _num_parallel_cores():
    """TensorCores addressable via a 'parallel' grid axis on this chip."""
    try:
        kind = jax.devices()[0].device_kind.lower()
    except Exception:
        return 1
    return 2 if any(m in kind for m in ("v4", "v5p", "v7", "7x")) else 1


# ---------------------------------------------------------------------------
# Fused Pallas kernel (one grid step == one batch block on one TensorCore)
# ---------------------------------------------------------------------------

def seq2seq_kernel(bert_ref, dh_ref, wtop_ref, wq_ref, wheads_ref,
                   wdbias_ref, bfull_ref, out_ref):
    Bb, T, E = bert_ref.shape
    H = dh_ref.shape[-1]
    scale = 1.0 / math.sqrt(H)

    # ---- encoder on the whole (Bb*T, E) slab: h = tanh(bert @ Wtop + data_h) ----
    bert = bert_ref[...].reshape(Bb * T, E).astype(jnp.bfloat16)
    h_all = jnp.tanh(
        jnp.dot(bert, wtop_ref[...], preferred_element_type=jnp.float32)
        + dh_ref[...].reshape(Bb * T, H))                           # (Bb*T, H) f32

    wq = wq_ref[...]           # (H, 2H)  bf16: [wq2 | wq0]
    wheads = wheads_ref[...]   # (2H,128) bf16: lanes [0,64)=slot fold, [64,128)=intent fold
    wdbias = wdbias_ref[...]   # (H, 128) bf16: lanes [0,NS)=Ws2, rest 0
    bfull = bfull_ref[...]     # (1, 128) f32: b_slot | b_int, lane-packed

    for b in range(Bb):        # static, unrolled loop over the batch block
        h = h_all[b * T:(b + 1) * T]                                # (T, H) f32
        hb = h.astype(jnp.bfloat16)
        h_last = h[T - 1:T]                                         # (1, H)

        # Heads 0 and 2 merged: one q matmul, one score matmul, one softmax, one P@H.
        q_all = jnp.dot(hb, wq, preferred_element_type=jnp.float32)        # (T, 2H)
        Q = jnp.concatenate([q_all[:, :H],                          # q2 (all rows)
                             q_all[T - 1:T, H:]], axis=0)           # q0 (last row only)
        s = jax.lax.dot_general(Q.astype(jnp.bfloat16), hb,
                                (((1,), (1,)), ((), ())),
                                preferred_element_type=jnp.float32) * scale
        # No max-subtraction: h is tanh-bounded and the 0.1-scaled weights keep
        # |s| far below exp's f32 overflow point (revisit if the encoder changes).
        p = jnp.exp(s)
        p = p * pl.reciprocal(jnp.sum(p, axis=-1, keepdims=True), approx=True)
        A = jnp.dot(p.astype(jnp.bfloat16), hb,
                    preferred_element_type=jnp.float32)             # (T+1, H)
        # A rows [:T] == Attn[2] (slot_d), row T == Attn[0][:, -1, :] (intent_d).
        d = A[T:T + 1]                                              # (1, H)

        # Both output heads as ONE K=2H matmul into a lane-packed (T+1, 128) slab:
        #   rows[:T], lanes[:NS]      -> slots  = h @ Ws0 + a2 @ (Ws0+Ws1)
        #   row T,    lanes[64:64+NI] -> intent = h_last @ Wi0 + d @ (Wi0+Wi1)
        in_aug = jnp.concatenate(
            [jnp.concatenate([h, h_last], axis=0), A], axis=-1)     # (T+1, 2H)
        bias = (jnp.dot(d.astype(jnp.bfloat16), wdbias,
                        preferred_element_type=jnp.float32) + bfull)        # (1, 128)
        out_ref[b] = (jnp.dot(in_aug.astype(jnp.bfloat16), wheads,
                              preferred_element_type=jnp.float32) + bias)


# ---------------------------------------------------------------------------
# Wrapper: weight folding / lane packing + single pallas_call
# ---------------------------------------------------------------------------

def seq2seq_forward(params, bert_seq_in, data_seq_in, lens_seq_in=None):
    del lens_seq_in  # see TODO(synk) above
    B, T, E = bert_seq_in.shape
    H = params["w_enc"].shape[1]
    NI = params["w_int"].shape[-1]
    NS = params["w_slot"].shape[-1]

    # Fold embedding + bottom half of w_enc + encoder bias into a gather table:
    #   concat([bert, emb]) @ W_enc + b == bert @ W_enc[:E] + (embed @ W_enc[E:] + b)[tokens]
    tok_table = jnp.dot(params["embed"], params["w_enc"][E:]) + params["b_enc"]   # (V, H)
    data_h = jnp.take(tok_table, data_seq_in, axis=0)                             # (B, T, H)

    w_top = params["w_enc"][:E].astype(jnp.bfloat16)                              # (E, H)

    # Merged attention-head weights: [wq2 | wq0]  (head 1 is never consumed).
    wq_cat = jnp.concatenate([params["wq"][2], params["wq"][0]],
                             axis=1).astype(jnp.bfloat16)                         # (H, 2H)

    # Concat-linear heads folded ((a+b)@W0 + b@W1 == a@W0 + b@(W0+W1)), K-stacked to
    # 2H, and lane-packed into one (2H, 128) matrix (slot block | intent block).
    w_slot_cat = jnp.concatenate(
        [params["w_slot"][0], params["w_slot"][0] + params["w_slot"][1]], axis=0)  # (2H, NS)
    w_int_cat = jnp.concatenate(
        [params["w_int"][0], params["w_int"][0] + params["w_int"][1]], axis=0)     # (2H, NI)
    w_heads = (jnp.zeros((2 * H, NPAD), jnp.float32)
               .at[:, :NS].set(w_slot_cat)
               .at[:, HALF:HALF + NI].set(w_int_cat)).astype(jnp.bfloat16)

    w_dbias = (jnp.zeros((H, NPAD), jnp.float32)
               .at[:, :NS].set(params["w_slot"][2])).astype(jnp.bfloat16)
    b_full = (jnp.zeros((1, NPAD), jnp.float32)
              .at[:, :NS].set(params["b_slot"][0])
              .at[:, HALF:HALF + NI].set(params["b_int"][0]))

    # Batch blocking: one grid step per parallel TensorCore (grid=(1,) on v5e/v6e,
    # grid=(2,) on v7x / megacore chips).
    n_tc = _num_parallel_cores()
    G = max(1, min(B, n_tc))
    B_blk = -(-B // G)
    Bp = G * B_blk
    if Bp != B:
        pad = ((0, Bp - B), (0, 0), (0, 0))
        bert_seq_in = jnp.pad(bert_seq_in, pad)
        data_h = jnp.pad(data_h, pad)

    out = pl.pallas_call(
        seq2seq_kernel,
        out_shape=jax.ShapeDtypeStruct((Bp, T + 1, NPAD), jnp.float32),
        grid_spec=pltpu.PrefetchScalarGridSpec(
            num_scalar_prefetch=0,
            grid=(G,),
            in_specs=[
                pl.BlockSpec((B_blk, T, E), lambda g: (g, 0, 0)),      # bert
                pl.BlockSpec((B_blk, T, H), lambda g: (g, 0, 0)),      # data_h (+bias)
                pl.BlockSpec((E, H), lambda g: (0, 0)),                # w_enc top half
                pl.BlockSpec((H, 2 * H), lambda g: (0, 0)),            # [wq2|wq0]
                pl.BlockSpec((2 * H, NPAD), lambda g: (0, 0)),         # packed head weights
                pl.BlockSpec((H, NPAD), lambda g: (0, 0)),             # Ws2 (lane-packed)
                pl.BlockSpec((1, NPAD), lambda g: (0, 0)),             # packed biases
            ],
            out_specs=pl.BlockSpec((B_blk, T + 1, NPAD), lambda g: (g, 0, 0)),
        ),
        compiler_params=pltpu.CompilerParams(dimension_semantics=("parallel",)),
    )(bert_seq_in, data_h, w_top, wq_cat, w_heads, w_dbias, b_full)

    slots = out[:B, :T, :NS]
    intent = out[:B, T, HALF:HALF + NI]
    return intent, slots


# ---------------------------------------------------------------------------
# Pure-JAX reference (unchanged semantics of Seq2Seq.forward)
# ---------------------------------------------------------------------------

def seq2seq_reference(params, bert_seq_in, data_seq_in):
    hi = jax.lax.Precision.HIGHEST
    data_emb = jnp.take(params["embed"], data_seq_in, axis=0)
    x = jnp.concatenate([bert_seq_in, data_emb], axis=-1)
    h = jnp.tanh(jnp.einsum("btd,dh->bth", x, params["w_enc"], precision=hi)
                 + params["b_enc"][0])
    H = h.shape[-1]
    attn = []
    for k in range(3):
        q = jnp.einsum("bth,hg->btg", h, params["wq"][k], precision=hi)
        s = jnp.einsum("btg,bsg->bts", q, h, precision=hi) / math.sqrt(H)
        p = jax.nn.softmax(s, axis=-1)
        attn.append(jnp.einsum("bts,bsh->bth", p, h, precision=hi))
    out_last = h[:, -1, :]
    intent_d = attn[0][:, -1, :]
    intent = (jnp.dot(out_last + intent_d, params["w_int"][0], precision=hi)
              + jnp.dot(intent_d, params["w_int"][1], precision=hi)
              + params["b_int"][0])
    slots = (jnp.einsum("bth,hn->btn", h + attn[2], params["w_slot"][0], precision=hi)
             + jnp.einsum("bth,hn->btn", attn[2], params["w_slot"][1], precision=hi)
             + jnp.einsum("bh,hn->bn", intent_d, params["w_slot"][2], precision=hi)[:, None, :]
             + params["b_slot"][0])
    return intent, slots


# ---------------------------------------------------------------------------
# Main
# ---------------------------------------------------------------------------

if __name__ == "__main__":
    B, T = 2, 8            # batch, seq_len
    E, De = 16, 16         # BERT feature dim, token-embedding dim
    Din = E + De
    H = 32                 # encoder hidden
    V = 50                 # vocab size for DataSeqIn
    NI, NS = 8, 16         # num intents, num slot labels

    key = jax.random.PRNGKey(0)
    k_bert, k_tok, k_emb, k_enc, k_wq, k_int, k_slot = jax.random.split(key, 7)

    params = {
        "embed": 0.1 * jax.random.normal(k_emb, (V, De), jnp.float32),
        "w_enc": 0.1 * jax.random.normal(k_enc, (Din, H), jnp.float32),
        "b_enc": jnp.zeros((1, H), jnp.float32),
        "wq": 0.1 * jax.random.normal(k_wq, (3, H, H), jnp.float32),
        "w_int": 0.1 * jax.random.normal(k_int, (2, H, NI), jnp.float32),
        "b_int": 0.01 * jnp.ones((1, NI), jnp.float32),
        "w_slot": 0.1 * jax.random.normal(k_slot, (3, H, NS), jnp.float32),
        "b_slot": 0.01 * jnp.ones((1, NS), jnp.float32),
    }

    bert_seq_in = jax.random.normal(k_bert, (B, T, E), jnp.float32)
    data_seq_in = jax.random.randint(k_tok, (B, T), 0, V, jnp.int32)
    lens_seq_in = jnp.array([T, T - 2], jnp.int32)

    intent, slots = jax.jit(seq2seq_forward)(params, bert_seq_in, data_seq_in, lens_seq_in)
    jax.block_until_ready((intent, slots))

    ref_intent, ref_slots = seq2seq_reference(params, bert_seq_in, data_seq_in)
    # bf16 MXU operands + approx-reciprocal softmax -> compare at 2e-2 tolerance.
    ok = (intent.shape == (B, NI) and slots.shape == (B, T, NS)
          and bool(jnp.allclose(intent, ref_intent, atol=2e-2, rtol=2e-2))
          and bool(jnp.allclose(slots, ref_slots, atol=2e-2, rtol=2e-2)))
    if not ok:
        raise AssertionError("Pallas output does not match JAX reference")

    print("KERNEL_OK")
</pallas_src>

<mosaic_0001>
module attributes {stable_mosaic.version = 11 : i64} {
  func.func @seq2seq_kernel(%arg0: i32, %arg1: memref<2x8x16xf32, #tpu.memory_space<vmem>>, %arg2: memref<2x8x32xf32, #tpu.memory_space<vmem>>, %arg3: memref<16x32xbf16, #tpu.memory_space<vmem>>, %arg4: memref<32x64xbf16, #tpu.memory_space<vmem>>, %arg5: memref<64x128xbf16, #tpu.memory_space<vmem>>, %arg6: memref<32x128xbf16, #tpu.memory_space<vmem>>, %arg7: memref<1x128xf32, #tpu.memory_space<vmem>>, %arg8: memref<2x9x128xf32, #tpu.memory_space<vmem>>) attributes {dimension_semantics = [#tpu.dimension_semantics<parallel>], iteration_bounds = array<i64: 1>, scalar_prefetch = 0 : i64, scratch_operands = 0 : i64, tpu.core_type = #tpu.core_type<tc>, window_params = [{transform_indices = @transform_0, window_bounds = array<i64: 2, 8, 16>}, {transform_indices = @transform_1, window_bounds = array<i64: 2, 8, 32>}, {pipeline_mode = #tpu.pipeline_mode<synchronous>, transform_indices = @transform_2, window_bounds = array<i64: 16, 32>}, {pipeline_mode = #tpu.pipeline_mode<synchronous>, transform_indices = @transform_3, window_bounds = array<i64: 32, 64>}, {pipeline_mode = #tpu.pipeline_mode<synchronous>, transform_indices = @transform_4, window_bounds = array<i64: 64, 128>}, {pipeline_mode = #tpu.pipeline_mode<synchronous>, transform_indices = @transform_5, window_bounds = array<i64: 32, 128>}, {pipeline_mode = #tpu.pipeline_mode<synchronous>, transform_indices = @transform_6, window_bounds = array<i64: 1, 128>}, {transform_indices = @transform_7, window_bounds = array<i64: 2, 9, 128>}]} {
    %c0 = arith.constant 0 : index
    %c0_0 = arith.constant 0 : index
    %c0_1 = arith.constant 0 : index
    %0 = vector.load %arg1[%c0, %c0_0, %c0_1] : memref<2x8x16xf32, #tpu.memory_space<vmem>>, vector<2x8x16xf32>
    %1 = vector.shape_cast %0 : vector<2x8x16xf32> to vector<16x16xf32>
    %2 = arith.truncf %1 : vector<16x16xf32> to vector<16x16xbf16>
    %c0_2 = arith.constant 0 : index
    %c0_3 = arith.constant 0 : index
    %3 = vector.load %arg3[%c0_2, %c0_3] : memref<16x32xbf16, #tpu.memory_space<vmem>>, vector<16x32xbf16>
    %cst = arith.constant dense<0.000000e+00> : vector<16x32xf32>
    %4 = tpu.matmul %2, %3, %cst {dimension_numbers = #tpu.dot_dimension_numbers<[1], [0], [0], [1], [0, 0, 1, 1], [], []>} : vector<16x16xbf16>, vector<16x32xbf16>, vector<16x32xf32> -> vector<16x32xf32>
    %c0_4 = arith.constant 0 : index
    %c0_5 = arith.constant 0 : index
    %c0_6 = arith.constant 0 : index
    %5 = vector.load %arg2[%c0_4, %c0_5, %c0_6] : memref<2x8x32xf32, #tpu.memory_space<vmem>>, vector<2x8x32xf32>
    %6 = vector.shape_cast %5 : vector<2x8x32xf32> to vector<16x32xf32>
    %7 = arith.addf %4, %6 : vector<16x32xf32>
    %8 = math.tanh %7 : vector<16x32xf32>
    %c0_7 = arith.constant 0 : index
    %c0_8 = arith.constant 0 : index
    %9 = vector.load %arg4[%c0_7, %c0_8] : memref<32x64xbf16, #tpu.memory_space<vmem>>, vector<32x64xbf16>
    %c0_9 = arith.constant 0 : index
    %c0_10 = arith.constant 0 : index
    %10 = vector.load %arg5[%c0_9, %c0_10] : memref<64x128xbf16, #tpu.memory_space<vmem>>, vector<64x128xbf16>
    %c0_11 = arith.constant 0 : index
    %c0_12 = arith.constant 0 : index
    %11 = vector.load %arg6[%c0_11, %c0_12] : memref<32x128xbf16, #tpu.memory_space<vmem>>, vector<32x128xbf16>
    %c0_13 = arith.constant 0 : index
    %c0_14 = arith.constant 0 : index
    %12 = vector.load %arg7[%c0_13, %c0_14] : memref<1x128xf32, #tpu.memory_space<vmem>>, vector<1x128xf32>
    %13 = vector.extract_strided_slice %8 {offsets = [0, 0], sizes = [8, 32], strides = [1, 1]} : vector<16x32xf32> to vector<8x32xf32>
    %14 = arith.truncf %13 : vector<8x32xf32> to vector<8x32xbf16>
    %15 = vector.extract_strided_slice %13 {offsets = [7, 0], sizes = [1, 32], strides = [1, 1]} : vector<8x32xf32> to vector<1x32xf32>
    %cst_15 = arith.constant dense<0.000000e+00> : vector<8x64xf32>
    %16 = tpu.matmul %14, %9, %cst_15 {dimension_numbers = #tpu.dot_dimension_numbers<[1], [0], [0], [1], [0, 0, 1, 1], [], []>} : vector<8x32xbf16>, vector<32x64xbf16>, vector<8x64xf32> -> vector<8x64xf32>
    %17 = vector.extract_strided_slice %16 {offsets = [0, 0], sizes = [8, 32], strides = [1, 1]} : vector<8x64xf32> to vector<8x32xf32>
    %18 = vector.extract_strided_slice %16 {offsets = [7, 32], sizes = [1, 32], strides = [1, 1]} : vector<8x64xf32> to vector<1x32xf32>
    %19 = tpu.concatenate %17, %18 in 0 : vector<8x32xf32>, vector<1x32xf32> -> vector<9x32xf32>
    %20 = arith.truncf %19 : vector<9x32xf32> to vector<9x32xbf16>
    %cst_16 = arith.constant dense<0.000000e+00> : vector<9x8xf32>
    %21 = tpu.matmul %20, %14, %cst_16 {dimension_numbers = #tpu.dot_dimension_numbers<[1], [1], [0], [0], [0, 0, 1, 0], [], []>} : vector<9x32xbf16>, vector<8x32xbf16>, vector<9x8xf32> -> vector<9x8xf32>
    %cst_17 = arith.constant 0.176776692 : f32
    %22 = vector.broadcast %cst_17 : f32 to vector<9x8xf32>
    %23 = arith.mulf %21, %22 : vector<9x8xf32>
    %24 = math.exp %23 : vector<9x8xf32>
    %cst_18 = arith.constant dense<0.000000e+00> : vector<9xf32>
    %25 = vector.multi_reduction <add>, %24, %cst_18 [1] : vector<9x8xf32> to vector<9xf32>
    %26 = vector.shape_cast %25 : vector<9xf32> to vector<9x1xf32>
    %27 = tpu.reciprocal %26 {approx = true} : vector<9x1xf32> -> vector<9x1xf32>
    %28 = vector.broadcast %27 : vector<9x1xf32> to vector<9x8xf32>
    %29 = arith.mulf %24, %28 : vector<9x8xf32>
    %30 = arith.truncf %29 : vector<9x8xf32> to vector<9x8xbf16>
    %cst_19 = arith.constant dense<0.000000e+00> : vector<9x32xf32>
    %31 = tpu.matmul %30, %14, %cst_19 {dimension_numbers = #tpu.dot_dimension_numbers<[1], [0], [0], [1], [0, 0, 1, 1], [], []>} : vector<9x8xbf16>, vector<8x32xbf16>, vector<9x32xf32> -> vector<9x32xf32>
    %32 = vector.extract_strided_slice %31 {offsets = [8, 0], sizes = [1, 32], strides = [1, 1]} : vector<9x32xf32> to vector<1x32xf32>
    %33 = tpu.concatenate %13, %15 in 0 : vector<8x32xf32>, vector<1x32xf32> -> vector<9x32xf32>
    %34 = tpu.concatenate %33, %31 in 1 : vector<9x32xf32>, vector<9x32xf32> -> vector<9x64xf32>
    %35 = arith.truncf %32 : vector<1x32xf32> to vector<1x32xbf16>
    %cst_20 = arith.constant dense<0.000000e+00> : vector<1x128xf32>
    %36 = tpu.matmul %35, %11, %cst_20 {dimension_numbers = #tpu.dot_dimension_numbers<[1], [0], [0], [1], [0, 0, 1, 1], [], []>} : vector<1x32xbf16>, vector<32x128xbf16>, vector<1x128xf32> -> vector<1x128xf32>
    %37 = arith.addf %36, %12 : vector<1x128xf32>
    %38 = arith.truncf %34 : vector<9x64xf32> to vector<9x64xbf16>
    %cst_21 = arith.constant dense<0.000000e+00> : vector<9x128xf32>
    %39 = tpu.matmul %38, %10, %cst_21 {dimension_numbers = #tpu.dot_dimension_numbers<[1], [0], [0], [1], [0, 0, 1, 1], [], []>} : vector<9x64xbf16>, vector<64x128xbf16>, vector<9x128xf32> -> vector<9x128xf32>
    %40 = vector.broadcast %37 : vector<1x128xf32> to vector<9x128xf32>
    %41 = arith.addf %39, %40 : vector<9x128xf32>
    %c0_22 = arith.constant 0 : index
    %c0_23 = arith.constant 0 : index
    %c0_24 = arith.constant 0 : index
    %42 = vector.load %arg8[%c0_22, %c0_23, %c0_24] : memref<2x9x128xf32, #tpu.memory_space<vmem>>, vector<1x9x128xf32>
    %43 = vector.shape_cast %42 : vector<1x9x128xf32> to vector<9x128xf32>
    %44 = vector.shape_cast %41 : vector<9x128xf32> to vector<1x9x128xf32>
    tpu.vector_store %arg8[%c0_22, %c0_23, %c0_24], %44 {strides = array<i32>} : memref<2x9x128xf32, #tpu.memory_space<vmem>>, vector<1x9x128xf32>,
    %45 = vector.extract_strided_slice %8 {offsets = [8, 0], sizes = [8, 32], strides = [1, 1]} : vector<16x32xf32> to vector<8x32xf32>
    %46 = arith.truncf %45 : vector<8x32xf32> to vector<8x32xbf16>
    %47 = vector.extract_strided_slice %45 {offsets = [7, 0], sizes = [1, 32], strides = [1, 1]} : vector<8x32xf32> to vector<1x32xf32>
    %cst_25 = arith.constant dense<0.000000e+00> : vector<8x64xf32>
    %48 = tpu.matmul %46, %9, %cst_25 {dimension_numbers = #tpu.dot_dimension_numbers<[1], [0], [0], [1], [0, 0, 1, 1], [], []>} : vector<8x32xbf16>, vector<32x64xbf16>, vector<8x64xf32> -> vector<8x64xf32>
    %49 = vector.extract_strided_slice %48 {offsets = [0, 0], sizes = [8, 32], strides = [1, 1]} : vector<8x64xf32> to vector<8x32xf32>
    %50 = vector.extract_strided_slice %48 {offsets = [7, 32], sizes = [1, 32], strides = [1, 1]} : vector<8x64xf32> to vector<1x32xf32>
    %51 = tpu.concatenate %49, %50 in 0 : vector<8x32xf32>, vector<1x32xf32> -> vector<9x32xf32>
    %52 = arith.truncf %51 : vector<9x32xf32> to vector<9x32xbf16>
    %cst_26 = arith.constant dense<0.000000e+00> : vector<9x8xf32>
    %53 = tpu.matmul %52, %46, %cst_26 {dimension_numbers = #tpu.dot_dimension_numbers<[1], [1], [0], [0], [0, 0, 1, 0], [], []>} : vector<9x32xbf16>, vector<8x32xbf16>, vector<9x8xf32> -> vector<9x8xf32>
    %cst_27 = arith.constant 0.176776692 : f32
    %54 = vector.broadcast %cst_27 : f32 to vector<9x8xf32>
    %55 = arith.mulf %53, %54 : vector<9x8xf32>
    %56 = math.exp %55 : vector<9x8xf32>
    %cst_28 = arith.constant dense<0.000000e+00> : vector<9xf32>
    %57 = vector.multi_reduction <add>, %56, %cst_28 [1] : vector<9x8xf32> to vector<9xf32>
    %58 = vector.shape_cast %57 : vector<9xf32> to vector<9x1xf32>
    %59 = tpu.reciprocal %58 {approx = true} : vector<9x1xf32> -> vector<9x1xf32>
    %60 = vector.broadcast %59 : vector<9x1xf32> to vector<9x8xf32>
    %61 = arith.mulf %56, %60 : vector<9x8xf32>
    %62 = arith.truncf %61 : vector<9x8xf32> to vector<9x8xbf16>
    %cst_29 = arith.constant dense<0.000000e+00> : vector<9x32xf32>
    %63 = tpu.matmul %62, %46, %cst_29 {dimension_numbers = #tpu.dot_dimension_numbers<[1], [0], [0], [1], [0, 0, 1, 1], [], []>} : vector<9x8xbf16>, vector<8x32xbf16>, vector<9x32xf32> -> vector<9x32xf32>
    %64 = vector.extract_strided_slice %63 {offsets = [8, 0], sizes = [1, 32], strides = [1, 1]} : vector<9x32xf32> to vector<1x32xf32>
    %65 = tpu.concatenate %45, %47 in 0 : vector<8x32xf32>, vector<1x32xf32> -> vector<9x32xf32>
    %66 = tpu.concatenate %65, %63 in 1 : vector<9x32xf32>, vector<9x32xf32> -> vector<9x64xf32>
    %67 = arith.truncf %64 : vector<1x32xf32> to vector<1x32xbf16>
    %cst_30 = arith.constant dense<0.000000e+00> : vector<1x128xf32>
    %68 = tpu.matmul %67, %11, %cst_30 {dimension_numbers = #tpu.dot_dimension_numbers<[1], [0], [0], [1], [0, 0, 1, 1], [], []>} : vector<1x32xbf16>, vector<32x128xbf16>, vector<1x128xf32> -> vector<1x128xf32>
    %69 = arith.addf %68, %12 : vector<1x128xf32>
    %70 = arith.truncf %66 : vector<9x64xf32> to vector<9x64xbf16>
    %cst_31 = arith.constant dense<0.000000e+00> : vector<9x128xf32>
    %71 = tpu.matmul %70, %10, %cst_31 {dimension_numbers = #tpu.dot_dimension_numbers<[1], [0], [0], [1], [0, 0, 1, 1], [], []>} : vector<9x64xbf16>, vector<64x128xbf16>, vector<9x128xf32> -> vector<9x128xf32>
    %72 = vector.broadcast %69 : vector<1x128xf32> to vector<9x128xf32>
    %73 = arith.addf %71, %72 : vector<9x128xf32>
    %c1 = arith.constant 1 : index
    %c0_32 = arith.constant 0 : index
    %c0_33 = arith.constant 0 : index
    %74 = vector.load %arg8[%c1, %c0_32, %c0_33] : memref<2x9x128xf32, #tpu.memory_space<vmem>>, vector<1x9x128xf32>
    %75 = vector.shape_cast %74 : vector<1x9x128xf32> to vector<9x128xf32>
    %76 = vector.shape_cast %73 : vector<9x128xf32> to vector<1x9x128xf32>
    tpu.vector_store %arg8[%c1, %c0_32, %c0_33], %76 {strides = array<i32>} : memref<2x9x128xf32, #tpu.memory_space<vmem>>, vector<1x9x128xf32>,
    return
  }
  func.func @transform_0(%arg0: i32) -> (i32, i32, i32) {
    %c0_i32 = arith.constant 0 : i32
    %c0_i32_0 = arith.constant 0 : i32
    %c0_i32_1 = arith.constant 0 : i32
    return %arg0, %c0_i32, %c0_i32_0 : i32, i32, i32
  }
  func.func @transform_1(%arg0: i32) -> (i32, i32, i32) {
    %c0_i32 = arith.constant 0 : i32
    %c0_i32_0 = arith.constant 0 : i32
    %c0_i32_1 = arith.constant 0 : i32
    return %arg0, %c0_i32, %c0_i32_0 : i32, i32, i32
  }
  func.func @transform_2(%arg0: i32) -> (i32, i32) {
    %c0_i32 = arith.constant 0 : i32
    %c0_i32_0 = arith.constant 0 : i32
    %c0_i32_1 = arith.constant 0 : i32
    return %c0_i32, %c0_i32_0 : i32, i32
  }
  func.func @transform_3(%arg0: i32) -> (i32, i32) {
    %c0_i32 = arith.constant 0 : i32
    %c0_i32_0 = arith.constant 0 : i32
    %c0_i32_1 = arith.constant 0 : i32
    return %c0_i32, %c0_i32_0 : i32, i32
  }
  func.func @transform_4(%arg0: i32) -> (i32, i32) {
    %c0_i32 = arith.constant 0 : i32
    %c0_i32_0 = arith.constant 0 : i32
    %c0_i32_1 = arith.constant 0 : i32
    return %c0_i32, %c0_i32_0 : i32, i32
  }
  func.func @transform_5(%arg0: i32) -> (i32, i32) {
    %c0_i32 = arith.constant 0 : i32
    %c0_i32_0 = arith.constant 0 : i32
    %c0_i32_1 = arith.constant 0 : i32
    return %c0_i32, %c0_i32_0 : i32, i32
  }
  func.func @transform_6(%arg0: i32) -> (i32, i32) {
    %c0_i32 = arith.constant 0 : i32
    %c0_i32_0 = arith.constant 0 : i32
    %c0_i32_1 = arith.constant 0 : i32
    return %c0_i32, %c0_i32_0 : i32, i32
  }
  func.func @transform_7(%arg0: i32) -> (i32, i32, i32) {
    %c0_i32 = arith.constant 0 : i32
    %c0_i32_0 = arith.constant 0 : i32
    %c0_i32_1 = arith.constant 0 : i32
    return %arg0, %c0_i32, %c0_i32_0 : i32, i32, i32
  }
}

</mosaic_0001>

<bundles_post_ra>
// kernel: seq2seq_forward.1
= control target key start
LH: loop header
LB: loop body
LE: loop exit
PB: predicated region body
PF: predicated region fallthrough
CT: control target
= control target key end

     0   :  { %v875_v0 = vmov 0.0   ;;  %vm876_vm0 = vmmov 0   ;;  %vm40_vm1 = vcmask 130048   ;;  %vm117_vm2 = vcmask 261120   ;;  %s878_s23 = smov 32   ;;  %s1078_s2 = inlined_call_operand.vmem [shape: bf16[16,32], index: 2, kind: input, shape index: {}]   ;;  %s1079_s0 = inlined_call_operand.vmem [shape: f32[2,8,16], index: 0, kind: input, shape index: {}]   ;;  %s1080_s3 = inlined_call_operand.vmem [shape: bf16[32,64], index: 3, kind: input, shape index: {}]   ;;  %s1081_s1 = inlined_call_operand.vmem [shape: f32[2,8,32], index: 1, kind: input, shape index: {}]   ;;  %s1082_s5 = inlined_call_operand.vmem [shape: bf16[32,128], index: 5, kind: input, shape index: {}]   ;;  %s1083_s4 = inlined_call_operand.vmem [shape: bf16[64,128], index: 4, kind: input, shape index: {}]   ;;  %s1084_s6 = inlined_call_operand.vmem [shape: f32[1,128], index: 6, kind: input, shape index: {}]   ;;  %s1085_s7 = inlined_call_operand.vmem [shape: f32[2,9,128], index: 7, kind: output, shape index: {}]  }
   0x1   :  { %746 = vmatprep.subr.bf16.mxu0 %v875_v0  ;;  %v846_v1 = vld [vmem:[%s1078_s2] sm:$0xff]   ;;  %748 = vmatprep.mubr.msk.bf16.mxu0 %vm876_vm0, %v875_v0  ;;  %v28_v3 = vld [vmem:[%s1079_s0 + $0x8] sm:$0xff]  ;;  %vm233_vm3 = vcmask 1043456   ;;  %vm217_vm4 = vcmask 64512   ;;  %vm221_vm5 = vcmask 57344   ;;  %vm375_vm6 = vcmask 523264  }
   0x2   :  { %v27_v2 = vld [vmem:[%s1079_s0] sm:$0xff]  ;;  %766 = vmatprep.subr.bf16.mxu1 %v875_v0  ;;  %768 = vmatprep.mubr.msk.bf16.mxu1 %vm876_vm0, %v875_v0  ;;  %v940_v5 = vld [vmem:[%s1080_s3 + $0x8] sm:$0xff]  }
   0x3   :  { %747 = vmatpush3.bf16.msra.mxu0 %v846_v1  ;;  %v29_v4 = vpack.c.bf16 %v28_v3, %v27_v2  ;;  %v946_v6 = vld [vmem:[%s1080_s3] sm:$0xff]   ;;  %s877_s3 = smov 96   ;;  %v849_v36 = vld [vmem:[%s1082_s5 + $0x8] sm:$0xff]  }
   0x4   :  { %752 = vmatprep.subr.bf16.mxu0 %v875_v0  ;;  %v32_v7 = vld [vmem:[%s1081_s1] sm:$0xff]  ;;  %v33_v45 = vld [vmem:[%s1081_s1 + $0x8] sm:$0xff] }
   0x5   :  { %v850_v44 = vld [vmem:[%s1082_s5] sm:$0xff]  }
   0x6   :  { %749 = vmatmul.mubr.msk.bf16.vlgmr.msra.gmra.mxu0 %vm40_vm1, %v29_v4  ;;  %v851_v4 = vld [vmem:[%s1083_s4 + $0x18] sm:$0xff]  }
   0x7   :  { %756 = vmatprep.mubr.msk.bf16.mxu0 %vm876_vm0, %v875_v0  ;;  %753 = vmatpush3.bf16.msra.mxu0 %v940_v5 }
   0x8   :  { %754 = vmatprep.subr.bf16.mxu0 %v875_v0 }
   0xb   :  { %755 = vmatpush3.bf16.msra.mxu0 %v946_v6 }
   0xc   :  { %760 = vmatprep.subr.bf16.mxu0 %v875_v0 }
  0xc6   :  { %v78_v8 = vpop.f32.mrf.mxu0 }
  0xc7   :  { %v79_v9 = vadd.f32 %v78_v8, %v32_v7 }
  0xc8   :  { %v750_v10 = vpop.f32.mrf.mxu0 }
  0xc9   :  { %855 = vtanh.f32 %v79_v9 }
  0xca   :  { %v81_v11 = vpop.f32.mrf.mxu0 }
  0xcb   :  { %v82_v46 = vadd.f32 %v81_v11, %v33_v45 }
  0xcc   :  { %v751_v12 = vpop.f32.mrf.mxu0 }
  0xd6   :  { %v954_v13 = vpop.eup %855 }
  0xd7   :  { %v104_v14 = vpack.c.bf16 %v954_v13, %v954_v13 }
  0xd9   :  { %757 = vmatmul.mubr.msk.bf16.vlgmr.msra.gmra.mxu0 %vm117_vm2, %v104_v14  ;;  %v119_v15 = vsel %vm117_vm2, %v104_v14, 0  ;;  %v234_v16 = vsel %vm233_vm3, %v104_v14, 0 }
  0xda   :  { %761 = vmatpush3.bf16.xpose.msra.mxu0 %v119_v15  ;;  %767 = vmatpush3.bf16.msra.mxu1 %v234_v16 }
  0xdb   :  { %762 = vmatprep.mubr.msk.bf16.mxu0 %vm876_vm0, %v875_v0  ;;  %772 = vmatprep.subr.bf16.mxu0 %v875_v0 }
  0xdc   :  { %780 = vmatprep.subr.bf16.mxu1 %v875_v0 }
 0x199   :  { %v155_v17 = vpop.f32.mrf.mxu0 }
 0x19a   :  { %v162_v18 = vrot.slane %v155_v17, 7 }
 0x19b   :  { %v758_v19 = vpop.f32.mrf.mxu0 }
 0x19c   :  { %163 = vrot.lane.b32.xlu0 %v162_v18, %s877_s3  ;;  %v852_v18 = vld [vmem:[%s1083_s4 + $0x10] sm:$0xff]   ;;  %v853_v19 = vld [vmem:[%s1083_s4 + $0x8] sm:$0xff]  }
 0x19d   :  { %v158_v20 = vpop.f32.mrf.mxu0 }
 0x19e   :  { %v854_v20 = vld [vmem:[%s1083_s4] sm:$0xff]  }
 0x19f   :  { %v759_v21 = vpop.f32.mrf.mxu0 }
 0x20e   :  { %v164_v22 = vpop.permute.xlu0 %163 }
 0x20f   :  { %v166_v23 = vpack.c.bf16 %v164_v22, %v155_v17 }
 0x211   :  { %763 = vmatmul.mubr.msk.bf16.vlgmr.msra.gmra.mxu0 %vm117_vm2, %v166_v23 }
 0x212   :  { %776 = vmatprep.mubr.msk.bf16.mxu0 %vm876_vm0, %v875_v0  ;;  %773 = vmatpush3.bf16.msra.mxu0 %v849_v36 }
 0x213   :  { %774 = vmatprep.subr.bf16.mxu0 %v875_v0 }
 0x216   :  { %775 = vmatpush3.bf16.msra.mxu0 %v850_v44 }
 0x217   :  { %792 = vmatprep.subr.bf16.mxu0 %v875_v0 }
 0x2d1   :  { %v204_v24 = vpop.f32.mrf.mxu0 }
 0x2d2   :  { %v211_v25 = vmul.f32 0.17677669, %v204_v24  ;;  %v278_v24 = vrot.slane %v954_v13, 7 }
 0x2d3   :  { %v764_v26 = vpop.f32.mrf.mxu0 }
 0x2d4   :  { %v213_v27 = vmul.f32 1.442695, %v211_v25 }
 0x2d5   :  { %v207_v28 = vpop.f32.mrf.mxu0 }
 0x2d6   :  { %857 = vpow2.f32 %v213_v27  ;;  %v212_v29 = vmul.f32 0.17677669, %v207_v28 }
 0x2d7   :  { %v765_v30 = vpop.f32.mrf.mxu0 }
 0x2d8   :  { %v215_v31 = vmul.f32 1.442695, %v212_v29 }
 0x2da   :  { %859 = vpow2.f32 %v215_v31 }
 0x2e3   :  { %v858_v32 = vpop.eup %857 }
 0x2e4   :  { %v218_v33 = vsel %vm217_vm4, %v858_v32, 0.0 }
 0x2e5   :  { %219 = vadd.xlane.f32.xlu0 %v218_v33 }
 0x2e7   :  { %v860_v34 = vpop.eup %859 }
 0x2e8   :  { %v222_v35 = vsel %vm221_vm5, %v860_v34, 0.0 }
 0x2e9   :  { %223 = vadd.xlane.f32.xlu1 %v222_v35 }
 0x36e   :  { %v220_v37 = vpop.xlane.xlu0 %219 }
 0x36f   :  { %861 = vrcp.f32 %v220_v37  ;;  %v103_v37 = vld [vmem:[%s1084_s6] sm:$0x1] }
 0x372   :  { %v224_v38 = vpop.xlane.xlu1 %223 }
 0x373   :  { %863 = vrcp.f32 %v224_v38 }
 0x374   :  { %865 = vtanh.f32 %v82_v46 }
 0x37c   :  { %v862_v39 = vpop.eup %861 }
 0x37d   :  { %v227_v41 = vmul.f32 %v862_v39, %v858_v32 }
 0x380   :  { %v864_v40 = vpop.eup %863 }
 0x381   :  { %v228_v42 = vmul.f32 %v864_v40, %v860_v34  ;;  %v994_v53 = vpop.eup %865 }
 0x382   :  { %v1002_v54 = vpack.c.bf16 %v994_v53, %v994_v53 }
 0x383   :  { %v229_v43 = vpack.c.bf16 %v228_v42, %v227_v41 }
 0x384   :  { %v424_v55 = vsel %vm117_vm2, %v1002_v54, 0  ;;  %v536_v30 = vsel %vm233_vm3, %v1002_v54, 0 }
 0x385   :  { %769 = vmatmul.mubr.msk.bf16.vlgmr.msra.gmra.mxu1 %vm217_vm4, %v229_v43 }
 0x386   :  { %788 = vmatprep.mubr.msk.bf16.mxu1 %vm876_vm0, %v875_v0  ;;  %781 = vmatpush3.bf16.msra.mxu1 %v851_v4 }
 0x387   :  { %782 = vmatprep.subr.bf16.mxu1 %v875_v0 }
 0x38a   :  { %783 = vmatpush3.bf16.msra.mxu1 %v852_v18 }
 0x38b   :  { %784 = vmatprep.subr.bf16.mxu1 %v875_v0 }
 0x38e   :  { %785 = vmatpush3.bf16.msra.mxu1 %v853_v19 }
 0x38f   :  { %786 = vmatprep.subr.bf16.mxu1 %v875_v0 }
 0x392   :  { %787 = vmatpush3.bf16.msra.mxu1 %v854_v20 }
 0x393   :  { %806 = vmatprep.subr.bf16.mxu1 %v875_v0 }
 0x445   :  { %v985_v47 = vpop.f32.mrf.mxu1 }
 0x447   :  { %v770_v48 = vpop.f32.mrf.mxu1 }
 0x449   :  { %v987_v49 = vpop.f32.mrf.mxu1 }
 0x44a   :  { %v836_v50 = vpack.i.bf16 %v987_v49, %v985_v47  ;;  %v290_v51 = vpack.c.bf16 %v987_v49, %v987_v49 }
 0x44b   :  { %v771_v52 = vpop.f32.mrf.mxu1 }
 0x44c   :  { %777 = vmatmul.mubr.msk.bf16.vlgmr.msra.gmra.mxu0 %vm117_vm2, %v290_v51 }
 0x44d   :  { %793 = vmatpush3.bf16.msra.mxu0 %v940_v5  ;;  %796 = vmatprep.mubr.msk.bf16.mxu0 %vm876_vm0, %v875_v0 }
 0x44e   :  { %794 = vmatprep.subr.bf16.mxu0 %v875_v0 }
 0x451   :  { %795 = vmatpush3.bf16.msra.mxu0 %v946_v6 }
 0x452   :  { %800 = vmatprep.subr.bf16.mxu0 %v875_v0 }
 0x454   :  { %797 = vmatmul.mubr.msk.bf16.vlgmr.msra.gmra.mxu0 %vm117_vm2, %v1002_v54  ;;  %v580_v54 = vrot.slane %v994_v53, 7 }
 0x455   :  { %801 = vmatpush3.bf16.xpose.msra.mxu0 %v424_v55  ;;  %802 = vmatprep.mubr.msk.bf16.mxu0 %vm876_vm0, %v875_v0 }
 0x456   :  { %812 = vmatprep.subr.bf16.mxu0 %v875_v0 }
 0x50c   :  { %v1013_v56 = vpop.f32.mrf.mxu0 }
 0x50d   :  { %v341_v38 = vadd.f32 %v1013_v56, %v103_v37 }
 0x50e   :  { %v778_v57 = vpop.f32.mrf.mxu0 }
 0x510   :  { %v343_v58 = vpop.f32.mrf.mxu0 }
 0x512   :  { %v779_v59 = vpop.f32.mrf.mxu0 }
 0x514   :  { %v460_v60 = vpop.f32.mrf.mxu0 }
 0x515   :  { %v467_v61 = vrot.slane %v460_v60, 7 }
 0x516   :  { %v798_v62 = vpop.f32.mrf.mxu0 }
 0x517   :  { %468 = vrot.lane.b32.xlu1 %v467_v61, %s877_s3 }
 0x518   :  { %v463_v63 = vpop.f32.mrf.mxu0 }
 0x51a   :  { %v799_v1 = vpop.f32.mrf.mxu0 }
 0x589   :  { %v469_v2 = vpop.permute.xlu1 %468 }
 0x58a   :  { %v471_v3 = vpack.c.bf16 %v469_v2, %v460_v60 }
 0x58c   :  { %803 = vmatmul.mubr.msk.bf16.vlgmr.msra.gmra.mxu0 %vm117_vm2, %v471_v3 }
 0x58d   :  { %813 = vmatpush3.bf16.msra.mxu0 %v849_v36  ;;  %816 = vmatprep.mubr.msk.bf16.mxu0 %vm876_vm0, %v875_v0 }
 0x58e   :  { %814 = vmatprep.subr.bf16.mxu0 %v875_v0 }
 0x591   :  { %815 = vmatpush3.bf16.msra.mxu0 %v850_v44 }
 0x64c   :  { %v509_v5 = vpop.f32.mrf.mxu0 }
 0x64d   :  { %v516_v6 = vmul.f32 0.17677669, %v509_v5 }
 0x64e   :  { %v804_v7 = vpop.f32.mrf.mxu0 }
 0x64f   :  { %v518_v8 = vmul.f32 1.442695, %v516_v6 }
 0x650   :  { %v512_v9 = vpop.f32.mrf.mxu0 }
 0x651   :  { %867 = vpow2.f32 %v518_v8  ;;  %v517_v10 = vmul.f32 0.17677669, %v512_v9 }
 0x652   :  { %v805_v11 = vpop.f32.mrf.mxu0 }
 0x653   :  { %v520_v12 = vmul.f32 1.442695, %v517_v10 }
 0x655   :  { %869 = vpow2.f32 %v520_v12 }
 0x65e   :  { %v868_v14 = vpop.eup %867 }
 0x65f   :  { %v522_v15 = vsel %vm217_vm4, %v868_v14, 0.0 }
 0x660   :  { %523 = vadd.xlane.f32.xlu1 %v522_v15 }
 0x662   :  { %v870_v16 = vpop.eup %869 }
 0x663   :  { %v525_v17 = vsel %vm221_vm5, %v870_v16, 0.0 }
 0x664   :  { %526 = vadd.xlane.f32.xlu0 %v525_v17 }
 0x67a   :  { %837 = vrot.lane.b32.xlu0 %v836_v50, %s878_s23 }
 0x6e9   :  { %v524_v21 = vpop.xlane.xlu1 %523 }
 0x6ea   :  { %871 = vrcp.f32 %v524_v21 }
 0x6ed   :  { %v527_v22 = vpop.xlane.xlu0 %526 }
 0x6ee   :  { %873 = vrcp.f32 %v527_v22 }
 0x6f1   :  { %v838_v23 = vpop.permute.xlu0 %837 }
 0x6f2   :  { %v840_v25 = vunpack.i.h.bf16 %v838_v23  ;;  %v839_v26 = vunpack.i.l.bf16 %v838_v23 }
 0x6f4   :  { %v289_v27 = vsel %vm117_vm2, %v278_v24, %v840_v25  ;;  %v288_v28 = vsel %vm117_vm2, %v954_v13, %v839_v26  ;;  %v347_v13 = vlaneseq }
 0x6f5   :  { %v346_v29 = vpack.c.bf16 %v289_v27, %v288_v28 }
 0x6f6   :  { %v348_v36 = vshrl.u32 %v347_v13, 7 }
 0x6f7   :  { %789 = vmatmul.mubr.msk.bf16.vlgmr.msra.gmra.mxu1 %vm375_vm6, %v346_v29  ;;  %v872_v31 = vpop.eup %871 }
 0x6f8   :  { %807 = vmatpush3.bf16.msra.mxu1 %v536_v30  ;;  %808 = vmatprep.mubr.msk.bf16.mxu1 %vm876_vm0, %v875_v0  ;;  %v530_v33 = vmul.f32 %v872_v31, %v868_v14  ;;  %v349_v39 = vsub.s32 0, %v348_v36 }
 0x6f9   :  { %820 = vmatprep.subr.bf16.mxu1 %v875_v0 }
 0x6fa   :  { %v350_v40 = vrot.slane %v341_v38, %v349_v39 }
 0x6fb   :  { %v874_v32 = vpop.eup %873 }
 0x6fc   :  { %v531_v34 = vmul.f32 %v874_v32, %v870_v16 }
 0x6fe   :  { %v532_v35 = vpack.c.bf16 %v531_v34, %v530_v33 }
 0x700   :  { %809 = vmatmul.mubr.msk.bf16.vlgmr.msra.gmra.mxu1 %vm217_vm4, %v532_v35 }
 0x701   :  { %821 = vmatpush3.bf16.msra.mxu1 %v851_v4  ;;  %828 = vmatprep.mubr.msk.bf16.mxu1 %vm876_vm0, %v875_v0 }
 0x702   :  { %822 = vmatprep.subr.bf16.mxu1 %v875_v0 }
 0x705   :  { %823 = vmatpush3.bf16.msra.mxu1 %v852_v18 }
 0x706   :  { %824 = vmatprep.subr.bf16.mxu1 %v875_v0 }
 0x709   :  { %825 = vmatpush3.bf16.msra.mxu1 %v853_v19 }
 0x70a   :  { %826 = vmatprep.subr.bf16.mxu1 %v875_v0 }
 0x70d   :  { %827 = vmatpush3.bf16.msra.mxu1 %v854_v20 }
 0x7b7   :  { %v413_v41 = vpop.f32.mrf.mxu1 }
 0x7b8   :  { %v414_v42 = vadd.f32 %v413_v41, %v350_v40 }
 0x7b9   :  { %v790_v43 = vpop.f32.mrf.mxu1 }
 0x7ba   :  { %420 = vst [vmem:[%s1085_s7] sm:$0xff] %v414_v42 }
 0x7bb   :  { %v416_v44 = vpop.f32.mrf.mxu1 }
 0x7bc   :  { %v417_v0 = vadd.f32 %v416_v44, %v350_v40 }
 0x7bd   :  { %v791_v45 = vpop.f32.mrf.mxu1 }
 0x7be   :  { %421 = vst [vmem:[%s1085_s7 + $0x8] sm:$0x1] %v417_v0 }
 0x7c0   :  { %v572_v46 = vpop.f32.mrf.mxu1 }
 0x7c2   :  { %v810_v47 = vpop.f32.mrf.mxu1 }
 0x7c4   :  { %v575_v48 = vpop.f32.mrf.mxu1 }
 0x7c5   :  { %v841_v49 = vpack.i.bf16 %v575_v48, %v572_v46  ;;  %v592_v50 = vpack.c.bf16 %v575_v48, %v575_v48 }
 0x7c6   :  { %v811_v51 = vpop.f32.mrf.mxu1 }
 0x7c7   :  { %842 = vrot.lane.b32.xlu1 %v841_v49, %s878_s23  ;;  %817 = vmatmul.mubr.msk.bf16.vlgmr.msra.gmra.mxu0 %vm117_vm2, %v592_v50 }
 0x839   :  { %v843_v52 = vpop.permute.xlu1 %842 }
 0x83a   :  { %v845_v55 = vunpack.i.h.bf16 %v843_v52  ;;  %v844_v56 = vunpack.i.l.bf16 %v843_v52 }
 0x83c   :  { %v591_v57 = vsel %vm117_vm2, %v580_v54, %v845_v55  ;;  %v590_v58 = vsel %vm117_vm2, %v994_v53, %v844_v56 }
 0x83d   :  { %v636_v59 = vpack.c.bf16 %v591_v57, %v590_v58 }
 0x83f   :  { %829 = vmatmul.mubr.msk.bf16.vlgmr.msra.gmra.mxu1 %vm375_vm6, %v636_v59 }
 0x887   :  { %v630_v60 = vpop.f32.mrf.mxu0 }
 0x888   :  { %v631_v1 = vadd.f32 %v630_v60, %v103_v37 }
 0x889   :  { %v818_v61 = vpop.f32.mrf.mxu0 }
 0x88a   :  { %v640_v2 = vrot.slane %v631_v1, %v349_v39 }
 0x88b   :  { %v633_v62 = vpop.f32.mrf.mxu0 }
 0x88d   :  { %v819_v63 = vpop.f32.mrf.mxu0 }
 0x8ff   :  { %v678_v3 = vpop.f32.mrf.mxu1 }
 0x900   :  { %v679_v4 = vadd.f32 %v678_v3, %v640_v2 }
 0x901   :  { %v830_v5 = vpop.f32.mrf.mxu1 }
 0x902   :  { %712 = vst [vmem:[%s1085_s7 + $0x10] sm:$0xff] %v679_v4 }
 0x903   :  { %v681_v6 = vpop.f32.mrf.mxu1 }
 0x904   :  { %v682_v7 = vadd.f32 %v681_v6, %v640_v2 }
 0x905   :  { %v831_v8 = vpop.f32.mrf.mxu1 }
 0x906   :  { %713 = vst [vmem:[%s1085_s7 + $0x18] sm:$0x1] %v682_v7 }

</bundles_post_ra>
